<compile_context>
chip_gen: v7x
topology: tpu7x:2x2x1
jax: 0.10.0
libtpu: 0.0.40
codegen_flags: <defaults>
</compile_context>

<pallas_src>
import numpy as np
import jax
import jax.numpy as jnp
from jax.experimental import pallas as pl
from jax.experimental.pallas import tpu as pltpu


# ----------------------------- parameter builders (plain numpy glue) ---------

def hamming(n):
    return 0.54 - 0.46 * np.cos(2.0 * np.pi * np.arange(n) / (n - 1))


def dft_matrices(nfft):
    # scipy.linalg.dft(nfft): W[j,k] = exp(-2*pi*i*j*k/nfft)
    n = np.arange(nfft)
    ang = 2.0 * np.pi * np.outer(n, n) / nfft
    return np.cos(ang), -np.sin(ang)


def _hz2mel(hz):
    return 2595.0 * np.log10(1.0 + hz / 700.0)


def _mel2hz(mel):
    return 700.0 * (10.0 ** (mel / 2595.0) - 1.0)


def get_filterbanks(nfilt, nfft, samplerate=16000, lowfreq=0, highfreq=None):
    # python_speech_features-style triangular mel filterbank, (nfilt, nfft//2+1)
    highfreq = highfreq or samplerate / 2
    melpoints = np.linspace(_hz2mel(lowfreq), _hz2mel(highfreq), nfilt + 2)
    bins = np.floor((nfft + 1) * _mel2hz(melpoints) / samplerate).astype(np.int64)
    fbank = np.zeros((nfilt, nfft // 2 + 1))
    for j in range(nfilt):
        for i in range(bins[j], bins[j + 1]):
            fbank[j, i] = (i - bins[j]) / (bins[j + 1] - bins[j])
        for i in range(bins[j + 1], bins[j + 2]):
            fbank[j, i] = (bins[j + 2] - i) / (bins[j + 2] - bins[j + 1])
    return fbank


def create_dct_matrix(dim):
    C = np.zeros((dim, dim))
    for k in range(dim):
        for n in range(dim):
            if k == 0:
                C[k, n] = np.sqrt(1.0 / dim)
            else:
                C[k, n] = np.sqrt(2.0 / dim) * np.cos(np.pi * k * (0.5 + n) / dim)
    return C


def _round_up(x, m):
    return ((x + m - 1) // m) * m


def pack_params(window, real_fft, imag_fft, melbanks, dct_matrix, alpha, beta,
                nfft, compute_dtype=jnp.bfloat16):
    """Fold window + 1/nfft scale + pcmn alpha/beta into the weights, keep only
    DFT bins 0..nfft/2-1 (Nyquist mel weight asserted zero), and pad every
    feature axis to a lane-dense multiple of 128."""
    window = np.asarray(window, np.float64)
    real_fft = np.asarray(real_fft, np.float64)      # (nfft, nfft)
    imag_fft = np.asarray(imag_fft, np.float64)      # (nfft, nfft)
    melbanks = np.asarray(melbanks, np.float64)      # (F, nfft//2+1)
    dct_matrix = np.asarray(dct_matrix, np.float64)  # (F, F)
    alpha = np.asarray(alpha, np.float64).reshape(-1)
    beta = np.asarray(beta, np.float64).reshape(-1)

    L = window.shape[0]
    F = dct_matrix.shape[0]
    half = nfft // 2
    nbins = half + 1
    assert half % 128 == 0, "nfft//2 must be lane aligned (multiple of 128)"
    assert melbanks.shape == (F, nbins)
    # The module only uses bins 0..nfft/2; dropping the Nyquist bin as well is
    # exact iff its mel filterbank weight is zero (true for this builder).
    assert np.all(melbanks[:, half] == 0.0), \
        "Nyquist-bin mel weight must be zero to drop bins >= nfft/2"

    Luse = min(L, nfft)            # frames longer than nfft are truncated
    Fpad = _round_up(F, 128)       # lane-dense feature axis -> unmasked vst

    win = window[:Luse][:, None]
    # Combined windowed DFT for bins 0..half-1: one (Luse, 2*half) MXU matmul.
    dftw = np.concatenate([win * real_fft[:Luse, :half],
                           win * imag_fft[:Luse, :half]], axis=1)   # (Luse, 2*half)

    melT = np.zeros((half, Fpad))
    melT[:, :F] = melbanks[:, :half].T / nfft   # fold 1/nfft power-spectrum scale

    # pcmn folded into the (transposed, padded) ortho DCT-II:
    #   beta  * (logmel @ dctT)          == logmel        @ (dctT * beta[None, :])
    #   alpha * mean_T(logmel @ dctT)    == mean_T(logmel) @ (dctT * alpha[None, :])
    dctT_beta = np.zeros((Fpad, Fpad))
    dctT_beta[:F, :F] = dct_matrix.T * beta[None, :]
    dctT_alpha = np.zeros((Fpad, Fpad))
    dctT_alpha[:F, :F] = dct_matrix.T * alpha[None, :]
    # Padded rows (>= F) are exactly zero, so log(eps) in the padded logmel
    # columns can never leak into the output.
    assert np.all(dctT_beta[F:, :] == 0.0) and np.all(dctT_alpha[F:, :] == 0.0)

    return dict(
        dftw=jnp.asarray(dftw, compute_dtype),
        melT=jnp.asarray(melT, jnp.float32),
        dctT_beta=jnp.asarray(dctT_beta, jnp.float32),
        dctT_alpha=jnp.asarray(dctT_alpha, jnp.float32),
        L=Luse, F=F, Fpad=Fpad, half=half, nfft=nfft,
        compute_dtype=compute_dtype,
    )


# ----------------------------- Pallas kernel ----------------------------------

def _make_kernel(compute_dtype):
    def kernel(x_ref, dftw_ref, melT_ref, dctb_ref, dcta_ref, o_ref):
        # x_ref:  (Bb*T, L)    frames (native dtype; window folded into dftw)
        # dftw:   (L, 2*half)  [win*real | win*imag], bins 0..half-1
        # melT:   (half, Fpad) melbanks.T / nfft
        # dctb:   (Fpad, Fpad) beta  * ortho-DCT^T (zero-padded)
        # dcta:   (Fpad, Fpad) alpha * ortho-DCT^T (zero-padded)
        # o_ref:  (Bb, T, Fpad)
        Bb, T, Fpad = o_ref.shape
        half = dftw_ref.shape[1] // 2

        # learnable windowed DFT: in-kernel cast to MXU-native dtype, f32 acc.
        x2 = x_ref[...].astype(compute_dtype)
        ri = jnp.dot(x2, dftw_ref[...], preferred_element_type=jnp.float32)
        real = ri[:, :half]                       # lane-aligned slices
        imag = ri[:, half:]
        spec = real * real + imag * imag          # power spectrum (1/nfft in melT)
        mel = jnp.dot(spec, melT_ref[...], preferred_element_type=jnp.float32)
        eps = jnp.finfo(jnp.float32).eps
        logmel = jnp.log(jnp.maximum(mel, eps))   # self_log clamp
        # features (beta folded) and pcmn mean term (alpha folded)
        yb = jnp.dot(logmel, dctb_ref[...], preferred_element_type=jnp.float32)
        mean_lm = jnp.mean(logmel.reshape(Bb, T, Fpad), axis=1)         # (Bb, Fpad)
        norm = jnp.dot(mean_lm, dcta_ref[...], preferred_element_type=jnp.float32)
        o_ref[...] = (yb.reshape(Bb, T, Fpad) - norm[:, None, :]).astype(o_ref.dtype)
    return kernel


# ----------------------------- wrapper -----------------------------------------

def _choose_block_batch(B, T, target_rows, max_rows=4096):
    """Pick Bb (utterances per grid step) as a divisor of B: no batch padding,
    rows ~ target_rows (prefer multiples of 256), n_blocks >= 2 and even when
    possible so the parallel grid axis shards across both v7x TensorCores."""
    best_bb, best_score = 1, -1e18
    for bb in range(1, B + 1):
        if B % bb:
            continue
        rows = bb * T
        if rows > max_rows and bb != 1:
            continue
        nblk = B // bb
        score = -abs(rows - target_rows) / float(target_rows)
        if rows % 256 == 0:
            score += 0.5
        elif rows % 128 == 0:
            score += 0.25
        if nblk >= 2:
            score += 0.5
            if nblk % 2 == 0:
                score += 0.25
        if score > best_score:
            best_score, best_bb = score, bb
    return best_bb


def _vmem_limit_bytes(rows, L, packed, x_itemsize, out_itemsize):
    w_itemsize = jnp.dtype(packed["compute_dtype"]).itemsize
    half, Fpad = packed["half"], packed["Fpad"]
    x_block = rows * L * x_itemsize
    out_block = rows * Fpad * out_itemsize
    # resident weights (constant index_map) counted once, not double-buffered
    weights = (packed["dftw"].size * w_itemsize + packed["melT"].size * 4 +
               packed["dctT_beta"].size * 4 + packed["dctT_alpha"].size * 4)
    # in-kernel f32 temporaries (ri, spec, mel/logmel, yb)
    scratch = rows * (3 * half + 2 * Fpad) * 4
    need = 2 * (x_block + out_block) + weights + scratch
    try:  # keep ~25% headroom below physical VMEM (64 MiB/TC on v7x)
        cap = int(0.75 * pltpu.get_tpu_info().vmem_capacity_bytes)
    except Exception:
        cap = 48 * 1024 * 1024
    return int(min(max(int(1.5 * need), 32 * 1024 * 1024), cap))


def full_learnable_forward(x, packed, *, target_rows=1024,
                           out_dtype=jnp.float32, slice_output=True):
    """x: (B, T, L) float frames -> (B, T, F) pcmn-normalized features.

    target_rows ~1024 suits v5e/v7x; v6e (128 MiB VMEM) can take 2048-4096.
    out_dtype=jnp.bfloat16 halves the output writeback (biggest relative win on
    HBM-starved v5e); slice_output=False returns the padded (.., Fpad) slab and
    skips the extra slice pass if the consumer can read it directly."""
    B, T, Lin = x.shape
    L, F, Fpad = packed["L"], packed["F"], packed["Fpad"]
    assert T % 8 == 0, "T must be a multiple of 8 (sublane tile alignment)"
    assert Lin >= L

    x_in = x if Lin == L else x[:, :, :L]    # truncate frames longer than nfft

    Bb = _choose_block_batch(B, T, target_rows)
    n_blocks = B // Bb
    rows = Bb * T
    x2d = x_in.reshape(B * T, L)             # row-major contiguous, free reshape

    out = pl.pallas_call(
        _make_kernel(packed["compute_dtype"]),
        out_shape=jax.ShapeDtypeStruct((B, T, Fpad), out_dtype),
        grid=(n_blocks,),
        in_specs=[
            pl.BlockSpec((rows, L), lambda b: (b, 0)),                   # frames
            pl.BlockSpec(packed["dftw"].shape, lambda b: (0, 0)),        # win*DFT[re|im]
            pl.BlockSpec(packed["melT"].shape, lambda b: (0, 0)),        # mel^T / nfft
            pl.BlockSpec(packed["dctT_beta"].shape, lambda b: (0, 0)),   # beta*DCT^T
            pl.BlockSpec(packed["dctT_alpha"].shape, lambda b: (0, 0)),  # alpha*DCT^T
        ],
        out_specs=pl.BlockSpec((Bb, T, Fpad), lambda b: (b, 0, 0)),
        compiler_params=pltpu.CompilerParams(
            dimension_semantics=("parallel",),
            vmem_limit_bytes=_vmem_limit_bytes(
                rows, L, packed, x.dtype.itemsize, jnp.dtype(out_dtype).itemsize),
        ),
    )(x2d, packed["dftw"], packed["melT"],
      packed["dctT_beta"], packed["dctT_alpha"])

    return out[:, :, :F] if slice_output else out


# ----------------------------- driver ------------------------------------------

if __name__ == "__main__":
    # Small shapes consistent with the module: B utterances, T frames of L samples.
    B, T, L = 8, 16, 200
    nfft = 256
    feats_dim = 13
    nbins = nfft // 2 + 1

    key = jax.random.PRNGKey(0)
    kx, ka = jax.random.split(key)
    x = jax.random.normal(kx, (B, T, L), dtype=jnp.float32)

    # Deterministic parameter initialization (mirrors FullLearnable.__init__ shapes).
    window = hamming(L)                                       # (L,)
    rw, iw = dft_matrices(nfft)                               # (nfft, nfft) each
    melbanks = get_filterbanks(feats_dim, nfft)               # (F, nbins)
    dct_m = create_dct_matrix(feats_dim)                      # (F, F)
    alpha = np.asarray(jax.random.normal(ka, (feats_dim,), dtype=jnp.float32)) \
        * np.sqrt(2.0 / (2 * feats_dim))                      # xavier-style normal
    beta = np.ones((feats_dim,), np.float64)                  # frozen at ones

    # ----- numpy float64 reference (mirrors FullLearnable.forward with pcmn) -----
    xn = np.asarray(x, np.float64)
    txn = xn * window[None, None, :]
    txn = np.concatenate([txn, np.zeros((B, T, nfft - L))], axis=-1)
    realn = txn @ rw[:, :nbins]
    imagn = txn @ iw[:, :nbins]
    specn = (realn ** 2 + imagn ** 2) / nfft
    meln = specn @ melbanks.T
    meln[meln <= 0.0] = np.finfo(np.float32).eps
    yn = np.log(meln) @ dct_m.T
    refn = (beta[None, None, :] * yn
            - alpha[None, None, :] * yn.mean(axis=1, keepdims=True))

    # f32 operand path: strict correctness check.
    packed32 = pack_params(window, rw, iw, melbanks, dct_m, alpha, beta, nfft,
                           compute_dtype=jnp.float32)
    out32 = jax.block_until_ready(full_learnable_forward(x, packed32))
    np.testing.assert_allclose(np.asarray(out32), refn, rtol=1e-2, atol=1e-2)

    # bf16 DFT-operand path (default: native MXU dtype on v5e/v6e/v7x, f32
    # accumulation, cast done in-kernel): looser tolerance, still feature-accurate.
    packed16 = pack_params(window, rw, iw, melbanks, dct_m, alpha, beta, nfft)
    out16 = jax.block_until_ready(full_learnable_forward(x, packed16))
    np.testing.assert_allclose(np.asarray(out16), refn, rtol=5e-2, atol=5e-2)

    print("KERNEL_OK")
</pallas_src>

<mosaic_0001>
module attributes {stable_mosaic.version = 11 : i64} {
  func.func @kernel(%arg0: i32, %arg1: memref<64x200xf32, #tpu.memory_space<vmem>>, %arg2: memref<200x256xf32, #tpu.memory_space<vmem>>, %arg3: memref<128x128xf32, #tpu.memory_space<vmem>>, %arg4: memref<128x128xf32, #tpu.memory_space<vmem>>, %arg5: memref<128x128xf32, #tpu.memory_space<vmem>>, %arg6: memref<4x16x128xf32, #tpu.memory_space<vmem>>) attributes {dimension_semantics = [#tpu.dimension_semantics<parallel>], iteration_bounds = array<i64: 2>, scalar_prefetch = 0 : i64, scratch_operands = 0 : i64, tpu.core_type = #tpu.core_type<tc>, window_params = [{transform_indices = @transform_0, window_bounds = array<i64: 64, 200>}, {pipeline_mode = #tpu.pipeline_mode<synchronous>, transform_indices = @transform_1, window_bounds = array<i64: 200, 256>}, {pipeline_mode = #tpu.pipeline_mode<synchronous>, transform_indices = @transform_2, window_bounds = array<i64: 128, 128>}, {pipeline_mode = #tpu.pipeline_mode<synchronous>, transform_indices = @transform_3, window_bounds = array<i64: 128, 128>}, {pipeline_mode = #tpu.pipeline_mode<synchronous>, transform_indices = @transform_4, window_bounds = array<i64: 128, 128>}, {transform_indices = @transform_5, window_bounds = array<i64: 4, 16, 128>}]} {
    %c0 = arith.constant 0 : index
    %c0_0 = arith.constant 0 : index
    %0 = vector.load %arg1[%c0, %c0_0] : memref<64x200xf32, #tpu.memory_space<vmem>>, vector<64x200xf32>
    %c0_1 = arith.constant 0 : index
    %c0_2 = arith.constant 0 : index
    %1 = vector.load %arg2[%c0_1, %c0_2] : memref<200x256xf32, #tpu.memory_space<vmem>>, vector<200x256xf32>
    %cst = arith.constant dense<0.000000e+00> : vector<64x256xf32>
    %2 = tpu.matmul %0, %1, %cst {dimension_numbers = #tpu.dot_dimension_numbers<[1], [0], [0], [1], [0, 0, 1, 1], [], []>} : vector<64x200xf32>, vector<200x256xf32>, vector<64x256xf32> -> vector<64x256xf32>
    %3 = vector.extract_strided_slice %2 {offsets = [0, 0], sizes = [64, 128], strides = [1, 1]} : vector<64x256xf32> to vector<64x128xf32>
    %4 = vector.extract_strided_slice %2 {offsets = [0, 128], sizes = [64, 128], strides = [1, 1]} : vector<64x256xf32> to vector<64x128xf32>
    %5 = arith.mulf %3, %3 : vector<64x128xf32>
    %6 = arith.mulf %4, %4 : vector<64x128xf32>
    %7 = arith.addf %5, %6 : vector<64x128xf32>
    %c0_3 = arith.constant 0 : index
    %c0_4 = arith.constant 0 : index
    %8 = vector.load %arg3[%c0_3, %c0_4] : memref<128x128xf32, #tpu.memory_space<vmem>>, vector<128x128xf32>
    %cst_5 = arith.constant dense<0.000000e+00> : vector<64x128xf32>
    %9 = tpu.matmul %7, %8, %cst_5 {dimension_numbers = #tpu.dot_dimension_numbers<[1], [0], [0], [1], [0, 0, 1, 1], [], []>} : vector<64x128xf32>, vector<128x128xf32>, vector<64x128xf32> -> vector<64x128xf32>
    %cst_6 = arith.constant 1.1920929E-7 : f32
    %10 = vector.broadcast %cst_6 : f32 to vector<64x128xf32>
    %11 = arith.maximumf %9, %10 : vector<64x128xf32>
    %12 = math.log %11 : vector<64x128xf32>
    %c0_7 = arith.constant 0 : index
    %c0_8 = arith.constant 0 : index
    %13 = vector.load %arg4[%c0_7, %c0_8] : memref<128x128xf32, #tpu.memory_space<vmem>>, vector<128x128xf32>
    %cst_9 = arith.constant dense<0.000000e+00> : vector<64x128xf32>
    %14 = tpu.matmul %12, %13, %cst_9 {dimension_numbers = #tpu.dot_dimension_numbers<[1], [0], [0], [1], [0, 0, 1, 1], [], []>} : vector<64x128xf32>, vector<128x128xf32>, vector<64x128xf32> -> vector<64x128xf32>
    %15 = vector.shape_cast %12 : vector<64x128xf32> to vector<4x16x128xf32>
    %cst_10 = arith.constant dense<0.000000e+00> : vector<4x128xf32>
    %16 = vector.multi_reduction <add>, %15, %cst_10 [1] : vector<4x16x128xf32> to vector<4x128xf32>
    %cst_11 = arith.constant 1.600000e+01 : f32
    %17 = vector.broadcast %cst_11 : f32 to vector<4x128xf32>
    %18 = arith.divf %16, %17 : vector<4x128xf32>
    %c0_12 = arith.constant 0 : index
    %c0_13 = arith.constant 0 : index
    %19 = vector.load %arg5[%c0_12, %c0_13] : memref<128x128xf32, #tpu.memory_space<vmem>>, vector<128x128xf32>
    %cst_14 = arith.constant dense<0.000000e+00> : vector<4x128xf32>
    %20 = tpu.matmul %18, %19, %cst_14 {dimension_numbers = #tpu.dot_dimension_numbers<[1], [0], [0], [1], [0, 0, 1, 1], [], []>} : vector<4x128xf32>, vector<128x128xf32>, vector<4x128xf32> -> vector<4x128xf32>
    %21 = vector.shape_cast %14 : vector<64x128xf32> to vector<4x16x128xf32>
    %22 = vector.shape_cast %20 : vector<4x128xf32> to vector<4x1x128xf32>
    %23 = vector.broadcast %22 : vector<4x1x128xf32> to vector<4x16x128xf32>
    %24 = arith.subf %21, %23 : vector<4x16x128xf32>
    %c0_15 = arith.constant 0 : index
    %c0_16 = arith.constant 0 : index
    %c0_17 = arith.constant 0 : index
    %25 = vector.load %arg6[%c0_15, %c0_16, %c0_17] : memref<4x16x128xf32, #tpu.memory_space<vmem>>, vector<4x16x128xf32>
    tpu.vector_store %arg6[%c0_15, %c0_16, %c0_17], %24 {strides = array<i32>} : memref<4x16x128xf32, #tpu.memory_space<vmem>>, vector<4x16x128xf32>,
    return
  }
  func.func @transform_0(%arg0: i32) -> (i32, i32) {
    %c0_i32 = arith.constant 0 : i32
    %c0_i32_0 = arith.constant 0 : i32
    return %arg0, %c0_i32 : i32, i32
  }
  func.func @transform_1(%arg0: i32) -> (i32, i32) {
    %c0_i32 = arith.constant 0 : i32
    %c0_i32_0 = arith.constant 0 : i32
    %c0_i32_1 = arith.constant 0 : i32
    return %c0_i32, %c0_i32_0 : i32, i32
  }
  func.func @transform_2(%arg0: i32) -> (i32, i32) {
    %c0_i32 = arith.constant 0 : i32
    %c0_i32_0 = arith.constant 0 : i32
    %c0_i32_1 = arith.constant 0 : i32
    return %c0_i32, %c0_i32_0 : i32, i32
  }
  func.func @transform_3(%arg0: i32) -> (i32, i32) {
    %c0_i32 = arith.constant 0 : i32
    %c0_i32_0 = arith.constant 0 : i32
    %c0_i32_1 = arith.constant 0 : i32
    return %c0_i32, %c0_i32_0 : i32, i32
  }
  func.func @transform_4(%arg0: i32) -> (i32, i32) {
    %c0_i32 = arith.constant 0 : i32
    %c0_i32_0 = arith.constant 0 : i32
    %c0_i32_1 = arith.constant 0 : i32
    return %c0_i32, %c0_i32_0 : i32, i32
  }
  func.func @transform_5(%arg0: i32) -> (i32, i32, i32) {
    %c0_i32 = arith.constant 0 : i32
    %c0_i32_0 = arith.constant 0 : i32
    %c0_i32_1 = arith.constant 0 : i32
    return %arg0, %c0_i32, %c0_i32_0 : i32, i32, i32
  }
}

</mosaic_0001>

<bundles_post_ra>
// kernel: tpu_custom_call.1
= control target key start
LH: loop header
LB: loop body
LE: loop exit
PB: predicated region body
PF: predicated region fallthrough
CT: control target
= control target key end

     0   :  { %10 = vsyncpa [#allocation3], 0  ;;  %s2104_s0 = inlined_call_operand.vmem [shape: f32[128,200], index: 0, kind: input, shape index: {}]   ;;  %s2105_s1 = inlined_call_operand.vmem [shape: f32[200,256], index: 1, kind: input, shape index: {}]   ;;  %s2106_s2 = inlined_call_operand.hbm [shape: f32[128,128], index: 2, kind: input, shape index: {}]   ;;  %s2107_s3 = inlined_call_operand.hbm [shape: f32[128,128], index: 3, kind: input, shape index: {}]   ;;  %s2108_s4 = inlined_call_operand.hbm [shape: f32[128,128], index: 4, kind: input, shape index: {}]   ;;  %s2109_s5 = inlined_call_operand.hbm [shape: f32[8,16,128], index: 5, kind: output, shape index: {}]  }
   0x1   :  { %11 = vsyncpa [#allocation6], 0 }
   0x2   :  { %12 = vsyncpa [#allocation4], 0 }
   0x3   :  { %14 = vsyncpa [#allocation4 + $0x1], 0  ;;  %s1713_s18 = smov 0   ;;  %s1715_s19 = smov 0  }
   0x4   :  { %s1717_s20 = smov 0   ;;  %s1719_s21 = smov 0  }
   0x5 LB: > { %s1734_s22 = sadd.s32 4294967295, %s1669_s21   ;;  %s1066_s23 = sadd.s32 4294967294, %s1669_s21   ;;  %s1669_s21 = sphi %s1719_s21, %s2130_s21   ;;  %s1665_s20 = sphi %s1717_s20, %s2129_s20   ;;  %s1661_s19 = sphi %s1715_s19, %s2128_s19   ;;  %s1657_s18 = sphi %s1713_s18, %s2127_s18  }
   0x6   : > { %s1738_s24 = sadd.s32 1, %s1669_s21   ;;  %s137_s25 = sadd.s32 1, %s1665_s20 }
   0x7   : > { %s134_s26 = ssub.s32 %s1669_s21, %s1738_s24  ;;  %p147_p0 = scmp.ne.s32.totalorder %s1665_s20, %s1661_s19 }
   0x8   : > { %p135_p1 = scmp.eq.s32.totalorder %s134_s26, 0  ;;  %p148_p2 = scmp.eq.s32.totalorder %s1734_s22, 1 }
   0x9   : > { %p153_p3 = scmp.ne.s32.totalorder %s1661_s19, %s1657_s18  ;;  %p154_p4 = scmp.eq.s32.totalorder %s1066_s23, 1 }
   0xa   : > { %s1749_s27 = scalar_select %p135_p1, %s1665_s20, %s137_s25  }
   0xb   : > { %p1751_p5 = por %p148_p2, %p147_p0  ;;  %p1755_p6 = por %p154_p4, %p153_p3 }
   0xc   : > { %2113 = sst [smem:[#allocation12_spill]] %s1749_s27  ;;  %p1067_p7 = scmp.ge.s32.totalorder %s1669_s21, 1 }
   0xd   : > { %s2114_s28 = scalar_select %p1751_p5, 1, 0 }
   0xe   : > { %s2115_s29 = scalar_select %p1755_p6, 1, 0 }
   0xf   : > { %p161_p8 = scmp.lt.s32.totalorder %s1669_s21, 3  ;;  %p2110_p9 = scmp.eq.s32.totalorder %s1734_s22, 0 }
  0x10   : > { %s1671_s6 = smov [#allocation5]   ;;  %s1672_s9 = smov [#allocation2]  }
  0x11   : > { %p1762_p10 = pnand %p1067_p7, %p161_p8  ;;  %s189_s7 = sshll.u32 %s1671_s6, 4  ;;  %s1768_s7 = int_to_ptr.vmem [resolvable:$true] %s189_s7 }
  0x12   : > { %s176_s10 = sshll.u32 %s1672_s9, 4  ;;  %s1673_s11 = smov [#allocation7]   ;;  %s1776_s10 = int_to_ptr.vmem [resolvable:$true] %s176_s10 }
  0x13   : > { %s2116_s30 = scalar_select %p1762_p10, 1, 0 }
  0x14   : > { %p1435_p11 = pneg %p1762_p10  ;;  %s1778_s12 = sshll.u32 %s1673_s11, 4  ;;  %s203_s12 = int_to_ptr.vmem [resolvable:$true] %s1778_s12 }
  0x15   : > { %s1515_s15 = scalar_lea.hbm %s2107_s3, 2048 }
  0x16   : > { %p1772_p12 = pnand %p2110_p9, %p1435_p11  ;;  %p1516_p13 = scmp.ne.s32.totalorder %s2107_s3, %s1515_s15 }
  0x17   : > { %p1522_p3 = scmp.lt.u32.totalorder %s1515_s15, %s2107_s3 }
  0x18   : > { %p1788_p0 = pneg %p1772_p12 }
  0x1a   : > { %p1518_p1 = pnand %p1788_p0, %p1516_p13 }
  0x1c   : > { %p1519_p2 = pneg %p1518_p1 }
  0x1e   : > { %p1524_p4 = pnand %p1522_p3, %p1519_p2 }
  0x20   : > { %1527 = shalt.err (!%p1524_p4)
}
  0x21   : > { %s1528_s6 = scalar_lea.vmem %s1768_s7, 2048  ;;  %p1536_p9 = scmp.lt.s32.totalorder %s1768_s7, %s1768_s7 }
  0x22   : > { %p1529_p7 = scmp.ne.s32.totalorder %s1768_s7, %s1528_s6  ;;  %p1537_p6 = scmp.lt.s32.totalorder %s1528_s6, %s1528_s6 }
  0x24   : > { %p1531_p8 = pnand %p1529_p7, %p1788_p0  ;;  %p1538_p13 = por %p1537_p6, %p1536_p9 }
  0x26   : > { %p1532_p11 = pneg %p1531_p8 }
  0x28   : > { %p1539_p1 = pnand %p1538_p13, %p1532_p11 }
  0x2a   : > { %1542 = shalt.err (!%p1539_p1)
}
  0x2b   : > { %s1674_s9 = smov 128   ;;  %s1675_s11 = smov 8  }
  0x2c   : > { %1441 = dma.hbm_to_vmem [thread:$0]  (!%p1772_p12), %s2107_s3, 2048, %s1768_s7, [#allocation6], %s1674_s9, %s1674_s9, %s1675_s11  }
  0x2d   : > { %s1543_s17 = scalar_lea.hbm %s2106_s2, 2048 }
  0x2e   : > { %p1544_p6 = scmp.ne.s32.totalorder %s2106_s2, %s1543_s17  ;;  %p1550_p3 = scmp.lt.u32.totalorder %s1543_s17, %s2106_s2 }
  0x30   : > { %p1546_p9 = pnand %p1544_p6, %p1788_p0 }
  0x32   : > { %p1547_p2 = pneg %p1546_p9 }
  0x34   : > { %p1552_p4 = pnand %p1550_p3, %p1547_p2 }
  0x36   : > { %1555 = shalt.err (!%p1552_p4)
}
  0x37   : > { %s1556_s7 = scalar_lea.vmem %s1776_s10, 2048  ;;  %p1564_p13 = scmp.lt.s32.totalorder %s1776_s10, %s1776_s10 }
  0x38   : > { %p1557_p7 = scmp.ne.s32.totalorder %s1776_s10, %s1556_s7  ;;  %p1565_p1 = scmp.lt.s32.totalorder %s1556_s7, %s1556_s7 }
  0x3a   : > { %p1559_p8 = pnand %p1557_p7, %p1788_p0  ;;  %p1566_p6 = por %p1565_p1, %p1564_p13 }
  0x3c   : > { %p1560_p11 = pneg %p1559_p8 }
  0x3e   : > { %p1567_p9 = pnand %p1566_p6, %p1560_p11 }
  0x40   : > { %1570 = shalt.err (!%p1567_p9)
}
  0x41   : > { %1438 = dma.hbm_to_vmem [thread:$0]  (!%p1772_p12), %s2106_s2, 2048, %s1776_s10, [#allocation3], %s1674_s9, %s1674_s9, %s1675_s11  }
  0x42   : > { %s1571_s16 = scalar_lea.hbm %s2108_s4, 2048 }
  0x43   : > { %p1572_p2 = scmp.ne.s32.totalorder %s2108_s4, %s1571_s16  ;;  %p1578_p7 = scmp.lt.u32.totalorder %s1571_s16, %s2108_s4 }
  0x45   : > { %p1574_p3 = pnand %p1572_p2, %p1788_p0 }
  0x47   : > { %p1575_p4 = pneg %p1574_p3 }
  0x49   : > { %p1580_p8 = pnand %p1578_p7, %p1575_p4 }
  0x4b   : > { %1583 = shalt.err (!%p1580_p8)
}
  0x4c   : > { %s1584_s7 = scalar_lea.vmem %s203_s12, 2048  ;;  %p1592_p6 = scmp.lt.s32.totalorder %s203_s12, %s203_s12 }
  0x4d   : > { %p1585_p11 = scmp.ne.s32.totalorder %s203_s12, %s1584_s7  ;;  %p1593_p9 = scmp.lt.s32.totalorder %s1584_s7, %s1584_s7 }
  0x4f   : > { %p1587_p13 = pnand %p1585_p11, %p1788_p0  ;;  %p1594_p5 = por %p1593_p9, %p1592_p6 }
  0x51   : > { %p1588_p1 = pneg %p1587_p13 }
  0x53   : > { %p1595_p10 = pnand %p1594_p5, %p1588_p1 }
  0x55   : > { %1598 = shalt.err (!%p1595_p10)
}
  0x56   : > { %1444 = dma.hbm_to_vmem [thread:$0]  (!%p1772_p12), %s2108_s4, 2048, %s203_s12, [#allocation6], %s1674_s9, %s1674_s9, %s1675_s11  }
  0x57   : > { %p2119_p2 = scmp.ne.s32.totalorder %s2116_s30, 0 }
  0x58   : > { %p2120_p0 = scmp.eq.s32.totalorder (!%p2119_p2), %s1734_s22, 0 }
  0x59   : > { %228 = sbr.rel (%p2119_p2) target bundleno = 882 (0x372), region = 40 }
  0x60   : > { %1644 = dma.done.wait (%p2120_p0), [#allocation3], 2048   ;;  %p2121_p3 = pmov %p2120_p0 }
  0x61   : > { %p2122_p5 = pmov %p2120_p0 }
  0x62   : > { %1646 = vsyncadd (%p2121_p3), [#allocation3], 4294965248 }
  0x63   : > { %1648 = dma.done.wait (%p2122_p5), [#allocation6], 4096   ;;  %p2123_p10 = pmov %p2120_p0 }
  0x64   : > { %s1077_s8 = sshll.u32 %s1734_s22, 3  ;;  %v290_v0 = vld [vmem:[%s2105_s1 + $0x8] sm:$0xff]  ;;  %v292_v1 = vld [vmem:[%s2105_s1 + $0x18] sm:$0xff]  ;;  %v289_v2 = vld [vmem:[%s2105_s1] sm:$0xff]  ;;  %vm339_vm0 = vcmask 588800   ;;  %vm1677_vm1 = vmmov 0  }
  0x65   : > { %1650 = vsyncadd (%p2123_p10), [#allocation6], 4294963200  ;;  %v1285_v3 = vpack.c.bf16 %v292_v1, %v290_v0  ;;  %v291_v4 = vld [vmem:[%s2105_s1 + $0x10] sm:$0xff]  ;;  %v294_v5 = vld [vmem:[%s2105_s1 + $0x28] sm:$0xff]  ;;  %p266_p12 = scmp.lt.s32.totalorder %s1077_s8, 15  ;;  %vm820_vm2 = vcmask 1041409  }
  0x66   : > { %v296_v6 = vld [vmem:[%s2105_s1 + $0x38] sm:$0xff]  ;;  %v1287_v7 = vpack.c.bf16 %v291_v4, %v289_v2  ;;  %v293_v9 = vld [vmem:[%s2105_s1 + $0x20] sm:$0xff]  ;;  %v295_v10 = vld [vmem:[%s2105_s1 + $0x30] sm:$0xff]  ;;  %vm822_vm3 = vcmask 1042434   ;;  %vm824_vm4 = vcmask 1043459   ;;  %s1096_s16 = sshll.u32 %s1734_s22, 10 }
  0x67   : > { %v1289_v8 = vpack.c.bf16 %v296_v6, %v294_v5  ;;  %v298_v11 = vld [vmem:[%s2105_s1 + $0x48] sm:$0xff]  ;;  %1286 = vmatprep.subr.bf16.mxu0 %v1285_v3  ;;  %v300_v12 = vld [vmem:[%s2105_s1 + $0x58] sm:$0xff]  ;;  %v1291_v13 = vpack.c.bf16 %v295_v10, %v293_v9  ;;  %v297_v15 = vld [vmem:[%s2105_s1 + $0x40] sm:$0xff]  ;;  %s2132_s8 = smov (!%p266_p12, %s1077_s8), 15  ;;  %p2124_p7 = scmp.ne.s32.totalorder %s2114_s28, 0 }
  0x68   : > { %1288 = vmatpush1.bf16.msra.mxu0 %v1287_v7  ;;  %v1293_v14 = vpack.c.bf16 %v300_v12, %v298_v11  ;;  %v299_v16 = vld [vmem:[%s2105_s1 + $0x50] sm:$0xff]  ;;  %v302_v17 = vld [vmem:[%s2105_s1 + $0x68] sm:$0xff]  ;;  %v304_v18 = vld [vmem:[%s2105_s1 + $0x78] sm:$0xff]  ;;  %s1094_s9 = sshll.u32 %s2132_s8, 4  ;;  %s2057_s8 = scalar_lea.hbm %s2109_s5, %s1096_s16 }
  0x69   : > { %1290 = vmatprep.subr.bf16.mxu0 %v1289_v8  ;;  %v1295_v19 = vpack.c.bf16 %v299_v16, %v297_v15  ;;  %v1297_v20 = vpack.c.bf16 %v304_v18, %v302_v17  ;;  %v301_v21 = vld [vmem:[%s2105_s1 + $0x60] sm:$0xff]  ;;  %v303_v22 = vld [vmem:[%s2105_s1 + $0x70] sm:$0xff]  ;;  %v306_v23 = vld [vmem:[%s2105_s1 + $0x88] sm:$0xff]  ;;  %s1934_s26 = scalar_lea.vmem %s2104_s0, %s1094_s9  ;;  %s1680_s27 = smov [#allocation8]  }
  0x6a   : > { %v308_v24 = vld [vmem:[%s2105_s1 + $0x98] sm:$0xff]  ;;  %v1299_v25 = vpack.c.bf16 %v303_v22, %v301_v21  ;;  %v305_v27 = vld [vmem:[%s2105_s1 + $0x80] sm:$0xff]  ;;  %v307_v28 = vld [vmem:[%s2105_s1 + $0x90] sm:$0xff]  ;;  %s1603_s23 = sshll.u32 %s1680_s27, 4  ;;  %s1604_s23 = int_to_ptr.vmem [resolvable:$false] %s1603_s23 }
  0x6b   : > { %v1301_v26 = vpack.c.bf16 %v308_v24, %v306_v23  ;;  %v310_v29 = vld [vmem:[%s2105_s1 + $0xa8] sm:$0xff]  ;;  %v312_v30 = vld [vmem:[%s2105_s1 + $0xb8] sm:$0xff]  ;;  %v1303_v31 = vpack.c.bf16 %v307_v28, %v305_v27  ;;  %v309_v34 = vld [vmem:[%s2105_s1 + $0xa0] sm:$0xff]  ;;  %s1605_s13 = scalar_lea.vmem %s1604_s23, 2048 }
  0x6c   : > { %1292 = vmatpush1.bf16.msra.mxu0 %v1291_v13  ;;  %v274_v32 = vld [vmem:[%s1934_s26 + $0x8] sm:$0xff]  ;;  %v1305_v33 = vpack.c.bf16 %v312_v30, %v310_v29  ;;  %v311_v35 = vld [vmem:[%s2105_s1 + $0xb0] sm:$0xff]  ;;  %v316_v37 = vld [vmem:[%s2105_s1 + $0xd8] sm:$0xff] }
  0x6d   : > { %1294 = vmatprep.subr.bf16.mxu0 %v1293_v14  ;;  %1080 = vmatprep.mubr.msk.f32.mxu0 %vm339_vm0, %v274_v32  ;;  %v314_v36 = vld [vmem:[%s2105_s1 + $0xc8] sm:$0xff]  ;;  %v1307_v38 = vpack.c.bf16 %v311_v35, %v309_v34  ;;  %v313_v39 = vld [vmem:[%s2105_s1 + $0xc0] sm:$0xff]  ;;  %v315_v41 = vld [vmem:[%s2105_s1 + $0xd0] sm:$0xff] }
  0x6e   : > { %v1309_v40 = vpack.c.bf16 %v316_v37, %v314_v36  ;;  %v318_v42 = vld [vmem:[%s2105_s1 + $0xe8] sm:$0xff]  ;;  %v320_v43 = vld [vmem:[%s2105_s1 + $0xf8] sm:$0xff]  ;;  %v501_v44 = vld [vmem:[#allocation2] sm:$0xff]  ;;  %v1311_v49 = vpack.c.bf16 %v315_v41, %v313_v39 }
  0x6f   : > { %v502_v45 = vld [vmem:[#allocation2 + $0x8] sm:$0xff]  ;;  %v503_v46 = vld [vmem:[#allocation2 + $0x10] sm:$0xff]  ;;  %v504_v48 = vld [vmem:[#allocation2 + $0x18] sm:$0xff]  ;;  %v1313_v53 = vpack.c.bf16 %v320_v43, %v318_v42 }
  0x70   : > { %1296 = vmatpush1.bf16.msra.mxu0 %v1295_v19  ;;  %v1333_v47 = vpack.c.bf16 %v502_v45, %v501_v44  ;;  %v1337_v50 = vpack.c.bf16 %v504_v48, %v503_v46  ;;  %v505_v51 = vld [vmem:[#allocation2 + $0x20] sm:$0xff]  ;;  %v506_v52 = vld [vmem:[#allocation2 + $0x28] sm:$0xff]  ;;  %v317_v54 = vld [vmem:[%s2105_s1 + $0xe0] sm:$0xff] }
  0x71   : > { %1298 = vmatprep.subr.bf16.mxu0 %v1297_v20  ;;  %v319_v55 = vld [vmem:[%s2105_s1 + $0xf0] sm:$0xff]  ;;  %v322_v56 = vld [vmem:[%s2105_s1 + $0x108] sm:$0xff]  ;;  %v324_v57 = vld [vmem:[%s2105_s1 + $0x118] sm:$0xff]  ;;  %v1341_v58 = vpack.c.bf16 %v506_v52, %v505_v51 }
  0x72   : > { %1334 = vmatprep.subr.bf16.mxu1 %v1333_v47  ;;  %v1315_v59 = vpack.c.bf16 %v319_v55, %v317_v54  ;;  %v507_v60 = vld [vmem:[#allocation2 + $0x30] sm:$0xff]  ;;  %v508_v61 = vld [vmem:[#allocation2 + $0x38] sm:$0xff]  ;;  %v1317_v62 = vpack.c.bf16 %v324_v57, %v322_v56  ;;  %v323_v0 = vld [vmem:[%s2105_s1 + $0x110] sm:$0xff] }
  0x73   : > { %1336 = vmatpush3.bf16.msra.mxu1 %v1333_v47  ;;  %v321_v63 = vld [vmem:[%s2105_s1 + $0x100] sm:$0xff]  ;;  %v326_v1 = vld [vmem:[%s2105_s1 + $0x128] sm:$0xff]  ;;  %v328_v2 = vld [vmem:[%s2105_s1 + $0x138] sm:$0xff]  ;;  %v1345_v3 = vpack.c.bf16 %v508_v61, %v507_v60 }
  0x74   : > { %1300 = vmatpush1.bf16.msra.mxu0 %v1299_v25  ;;  %1338 = vmatprep.subr.bf16.mxu1 %v1337_v50  ;;  %v1319_v4 = vpack.c.bf16 %v323_v0, %v321_v63  ;;  %v509_v5 = vld [vmem:[#allocation2 + $0x40] sm:$0xff]  ;;  %v510_v6 = vld [vmem:[#allocation2 + $0x48] sm:$0xff]  ;;  %v1321_v7 = vpack.c.bf16 %v328_v2, %v326_v1  ;;  %v325_v8 = vld [vmem:[%s2105_s1 + $0x120] sm:$0xff] }
  0x75   : > { %1302 = vmatprep.subr.bf16.mxu0 %v1301_v26  ;;  %v327_v9 = vld [vmem:[%s2105_s1 + $0x130] sm:$0xff]  ;;  %v330_v10 = vld [vmem:[%s2105_s1 + $0x148] sm:$0xff]  ;;  %v332_v11 = vld [vmem:[%s2105_s1 + $0x158] sm:$0xff]  ;;  %v1349_v12 = vpack.c.bf16 %v510_v6, %v509_v5 }
  0x76   : > { %v1323_v13 = vpack.c.bf16 %v327_v9, %v325_v8  ;;  %v511_v14 = vld [vmem:[#allocation2 + $0x50] sm:$0xff]  ;;  %v512_v15 = vld [vmem:[#allocation2 + $0x58] sm:$0xff]  ;;  %v1325_v16 = vpack.c.bf16 %v332_v11, %v330_v10  ;;  %v331_v18 = vld [vmem:[%s2105_s1 + $0x150] sm:$0xff] }
  0x77   : > { %1340 = vmatpush3.bf16.msra.mxu1 %v1337_v50  ;;  %v329_v17 = vld [vmem:[%s2105_s1 + $0x140] sm:$0xff]  ;;  %v334_v19 = vld [vmem:[%s2105_s1 + $0x168] sm:$0xff]  ;;  %v336_v20 = vld [vmem:[%s2105_s1 + $0x178] sm:$0xff]  ;;  %v1353_v21 = vpack.c.bf16 %v512_v15, %v511_v14 }
  0x78   : > { %1304 = vmatpush1.bf16.msra.mxu0 %v1303_v31  ;;  %1342 = vmatprep.subr.bf16.mxu1 %v1341_v58  ;;  %v1327_v22 = vpack.c.bf16 %v331_v18, %v329_v17  ;;  %v1329_v23 = vpack.c.bf16 %v336_v20, %v334_v19  ;;  %v333_v24 = vld [vmem:[%s2105_s1 + $0x160] sm:$0xff]  ;;  %v335_v25 = vld [vmem:[%s2105_s1 + $0x170] sm:$0xff]  ;;  %v338_v27 = vld [vmem:[%s2105_s1 + $0x188] sm:$0xff] }
  0x79   : > { %1306 = vmatprep.subr.bf16.mxu0 %v1305_v33  ;;  %v1331_v26 = vpack.c.bf16 %v335_v25, %v333_v24  ;;  %v337_v28 = vld [vmem:[%s2105_s1 + $0x180] sm:$0xff]  ;;  %v276_v30 = vld [vmem:[%s1934_s26 + $0x18] sm:$0xff]  ;;  %v275_v31 = vld [vmem:[%s1934_s26 + $0x10] sm:$0xff] }
  0x7a   : > { %v273_v29 = vld [vmem:[%s1934_s26] sm:$0xff]  ;;  %v278_v32 = vld [vmem:[%s1934_s26 + $0x28] sm:$0xff]  ;;  %v280_v34 = vld [vmem:[%s1934_s26 + $0x38] sm:$0xff] }
  0x7b   : > { %1344 = vmatpush3.bf16.msra.mxu1 %v1341_v58  ;;  %v277_v33 = vld [vmem:[%s1934_s26 + $0x20] sm:$0xff]  ;;  %v279_v35 = vld [vmem:[%s1934_s26 + $0x30] sm:$0xff]  ;;  %v282_v36 = vld [vmem:[%s1934_s26 + $0x48] sm:$0xff] }
  0x7c   : > { %1308 = vmatpush1.bf16.msra.mxu0 %v1307_v38  ;;  %1346 = vmatprep.subr.bf16.mxu1 %v1345_v3  ;;  %v281_v37 = vld [vmem:[%s1934_s26 + $0x40] sm:$0xff]  ;;  %v284_v38 = vld [vmem:[%s1934_s26 + $0x58] sm:$0xff]  ;;  %v283_v39 = vld [vmem:[%s1934_s26 + $0x50] sm:$0xff] }
  0x7d   : > { %1310 = vmatprep.subr.bf16.mxu0 %v1309_v40  ;;  %v286_v40 = vld [vmem:[%s1934_s26 + $0x68] sm:$0xff]  ;;  %v285_v41 = vld [vmem:[%s1934_s26 + $0x60] sm:$0xff]  ;;  %v288_v42 = vld [vmem:[%s1934_s26 + $0x78] sm:$0xff] }
  0x7e   : > { %v287_v43 = vld [vmem:[%s1934_s26 + $0x70] sm:$0xff]  ;;  %v514_v45 = vld [vmem:[#allocation2 + $0x68] sm:$0xff]  ;;  %v515_v47 = vld [vmem:[#allocation2 + $0x70] sm:$0xff]  ;;  %s262_s26 = sand.u32 1, %s1661_s19  }
  0x7f   : > { %1348 = vmatpush3.bf16.msra.mxu1 %v1345_v3  ;;  %v513_v44 = vld [vmem:[#allocation2 + $0x60] sm:$0xff]  ;;  %v516_v48 = vld [vmem:[#allocation2 + $0x78] sm:$0xff]  ;;  %v647_v51 = vld [vmem:[#allocation5 + $0x8] sm:$0xff]  ;;  %s1076_s15 = sshll.u32 %s262_s26, 6  ;;  %s2063_s22 = scalar_lea.sflag [#allocation4], %s262_s26 }
  0x80   : > { %1312 = vmatpush1.bf16.msra.mxu0 %v1311_v49  ;;  %1350 = vmatprep.subr.bf16.mxu1 %v1349_v12  ;;  %v1357_v46 = vpack.c.bf16 %v514_v45, %v513_v44  ;;  %v1361_v49 = vpack.c.bf16 %v516_v48, %v515_v47  ;;  %v646_v50 = vld [vmem:[#allocation5] sm:$0xff]  ;;  %v648_v61 = vld [vmem:[#allocation5 + $0x10] sm:$0xff]  ;;  %v651_v6 = vld [vmem:[#allocation5 + $0x28] sm:$0xff]  ;;  %s264_s17 = scalar_lea.vmem [#allocation8], %s1076_s15 }
  0x81   : > { %1314 = vmatprep.subr.bf16.mxu0 %v1313_v53  ;;  %v1365_v52 = vpack.c.bf16 %v647_v51, %v646_v50  ;;  %v650_v5 = vld [vmem:[#allocation5 + $0x20] sm:$0xff]  ;;  %v653_v14 = vld [vmem:[#allocation5 + $0x38] sm:$0xff]  ;;  %v659_v45 = vld [vmem:[#allocation5 + $0x68] sm:$0xff]  ;;  %s973_s25 = sshll.u32 %s264_s17, 4  ;;  %s2059_s25 = int_to_ptr.vmem [resolvable:$true] %s973_s25 }
  0x82   : > { %v1373_v10 = vpack.c.bf16 %v651_v6, %v650_v5  ;;  %v658_v44 = vld [vmem:[#allocation5 + $0x60] sm:$0xff]  ;;  %v660_v47 = vld [vmem:[#allocation5 + $0x70] sm:$0xff]  ;;  %v661_v48 = vld [vmem:[#allocation5 + $0x78] sm:$0xff]  ;;  %s1599_s10 = scalar_lea.vmem %s2059_s25, 1024  ;;  %p1606_p13 = scmp.lt.s32.totalorder %s2059_s25, %s1604_s23 }
  0x83   : > { %1352 = vmatpush3.bf16.msra.mxu1 %v1349_v12  ;;  %v800_v50 = vld [vmem:[#allocation7] sm:$0xff]  ;;  %v801_v51 = vld [vmem:[#allocation7 + $0x8] sm:$0xff]  ;;  %p1600_p4 = scmp.ne.s32.totalorder %s2059_s25, %s1599_s10  ;;  %p1607_p1 = scmp.lt.s32.totalorder %s1605_s13, %s1599_s10 }
  0x84   : > { %1316 = vmatpush1.bf16.msra.mxu0 %v1315_v59  ;;  %1354 = vmatprep.subr.bf16.mxu1 %v1353_v21  ;;  %v812_v5 = vld [vmem:[#allocation7 + $0x60] sm:$0xff]  ;;  %v813_v6 = vld [vmem:[#allocation7 + $0x68] sm:$0xff] }
  0x85   : > { %1318 = vmatprep.subr.bf16.mxu0 %v1317_v62  ;;  %v649_v62 = vld [vmem:[#allocation5 + $0x18] sm:$0xff]  ;;  %p1601_p8 = pnand %p1600_p4, %p2124_p7  ;;  %p1608_p6 = por %p1607_p1, %p1606_p13 }
  0x86   : > { %v1369_v2 = vpack.c.bf16 %v649_v62, %v648_v61  ;;  %v807_v61 = vld [vmem:[#allocation7 + $0x38] sm:$0xff] }
  0x87   : > { %1356 = vmatpush3.bf16.msra.mxu1 %v1353_v21  ;;  %p1602_p11 = pneg %p1601_p8 }
  0x88   : > { %1320 = vmatpush1.bf16.msra.mxu0 %v1319_v4  ;;  %1358 = vmatprep.subr.bf16.mxu1 %v1357_v46 }
  0x89   : > { %1322 = vmatprep.subr.bf16.mxu0 %v1321_v7  ;;  %p1609_p9 = pnand %p1608_p6, %p1602_p11 }
  0x8b   : > { %1360 = vmatpush3.bf16.msra.mxu1 %v1357_v46  ;;  %v1389_v46 = vpack.c.bf16 %v659_v45, %v658_v44 }
  0x8c   : > { %1324 = vmatpush1.bf16.msra.mxu0 %v1323_v13  ;;  %1362 = vmatprep.subr.bf16.mxu1 %v1361_v49  ;;  %v652_v13 = vld [vmem:[#allocation5 + $0x30] sm:$0xff] }
  0x8d   : > { %1326 = vmatprep.subr.bf16.mxu0 %v1325_v16  ;;  %v1377_v18 = vpack.c.bf16 %v653_v14, %v652_v13 }
  0x8f   : > { %1364 = vmatpush3.bf16.msra.mxu1 %v1361_v49  ;;  %v1393_v49 = vpack.c.bf16 %v661_v48, %v660_v47 }
  0x90   : > { %1328 = vmatpush1.bf16.msra.mxu0 %v1327_v22  ;;  %1366 = vmatprep.subr.bf16.mxu1 %v1365_v52 }
  0x91   : > { %1330 = vmatprep.subr.bf16.mxu0 %v1329_v23 }
  0x94   : > { %1332 = vmatpush1.bf16.msra.mxu0 %v1331_v26 }
  0x95   : > { %412 = vmatprep.subr.mxu0 %v338_v27 }
  0x98   : > { %413 = vmatpush1.msra.mxu0 %v337_v28 }
  0x99   : > { %429 = vmatmul.mubr.f32.vlgmr.msra.gmra.mrb[0].mxu0 %v273_v29 }
  0x9a   : > { %1081 = vmatprep.mubr.msk.f32.mxu0 %vm339_vm0, %v276_v30 }
  0x9d   : > { %435 = vmatmul.mubr.f32.gmra.mrb[2].mxu0 %v275_v31 }
  0x9e   : > { %1082 = vmatprep.mubr.msk.f32.mxu0 %vm339_vm0, %v278_v32 }
  0xa1   : > { %441 = vmatmul.mubr.f32.gmra.mrb[4].mxu0 %v277_v33 }
  0xa2   : > { %1083 = vmatprep.mubr.msk.f32.mxu0 %vm339_vm0, %v280_v34 }
  0xa5   : > { %447 = vmatmul.mubr.f32.gmra.mrb[6].mxu0 %v279_v35 }
  0xa6   : > { %1084 = vmatprep.mubr.msk.f32.mxu0 %vm339_vm0, %v282_v36 }
  0xa9   : > { %453 = vmatmul.mubr.f32.gmra.mrb[8].mxu0 %v281_v37 }
  0xaa   : > { %1085 = vmatprep.mubr.msk.f32.mxu0 %vm339_vm0, %v284_v38  ;;  %v654_v38 = vld [vmem:[#allocation5 + $0x40] sm:$0xff] }
  0xad   : > { %459 = vmatmul.mubr.f32.gmra.mrb[10].mxu0 %v283_v39  ;;  %v655_v39 = vld [vmem:[#allocation5 + $0x48] sm:$0xff] }
  0xae   : > { %1086 = vmatprep.mubr.msk.f32.mxu0 %vm339_vm0, %v286_v40  ;;  %v1381_v40 = vpack.c.bf16 %v655_v39, %v654_v38 }
  0xb1   : > { %465 = vmatmul.mubr.f32.gmra.mrb[12].mxu0 %v285_v41  ;;  %v656_v41 = vld [vmem:[#allocation5 + $0x50] sm:$0xff] }
  0xb2   : > { %1087 = vmatprep.mubr.msk.f32.mxu0 %vm339_vm0, %v288_v42  ;;  %v657_v42 = vld [vmem:[#allocation5 + $0x58] sm:$0xff] }
  0xb5   : > { %471 = vmatmul.mubr.f32.gmra.mrb[14].mxu0 %v287_v43  ;;  %v1385_v43 = vpack.c.bf16 %v657_v42, %v656_v41 }
 0x16c   : > { %v430_v53 = vpop.f32.mrb[0].mxu0 }
 0x16d   : > { %v477_v54 = vmul.f32 %v430_v53, %v430_v53  ;;  %v432_v55 = vpop.f32.mrb[1].mxu0  ;;  %v1676_v53 = vmov 0.0|0.0  }
 0x16e   : > { %v485_v56 = vmul.f32 %v432_v55, %v432_v55  ;;  %1397 = vmatprep.subr.bf16.mxu0 %v1676_v53  ;;  %v803_v55 = vld [vmem:[#allocation7 + $0x18] sm:$0xff] }
 0x170   : > { %v436_v57 = vpop.f32.mrb[2].mxu0  ;;  %v493_v58 = vadd.f32 %v485_v56, %v477_v54  ;;  %v802_v54 = vld [vmem:[#allocation7 + $0x10] sm:$0xff] }
 0x171   : > { %v478_v59 = vmul.f32 %v436_v57, %v436_v57  ;;  %v438_v60 = vpop.f32.mrb[3].mxu0  ;;  %v1401_v56 = vpack.c.bf16 %v803_v55, %v802_v54  ;;  %v804_v57 = vld [vmem:[#allocation7 + $0x20] sm:$0xff] }
 0x172   : > { %v486_v63 = vmul.f32 %v438_v60, %v438_v60  ;;  %1194 = vmatprep.mubr.f32.mxu1 %v493_v58  ;;  %v805_v58 = vld [vmem:[#allocation7 + $0x28] sm:$0xff]  ;;  %v806_v60 = vld [vmem:[#allocation7 + $0x30] sm:$0xff] }
 0x173   : > { %v1407_v62 = vpack.c.bf16 %v807_v61, %v806_v60 }
 0x174   : > { %v494_v0 = vadd.f32 %v486_v63, %v478_v59  ;;  %v442_v1 = vpop.f32.mrb[4].mxu0  ;;  %v1404_v59 = vpack.c.bf16 %v805_v58, %v804_v57  ;;  %v808_v63 = vld [vmem:[#allocation7 + $0x40] sm:$0xff] }
 0x175   : > { %v479_v3 = vmul.f32 %v442_v1, %v442_v1  ;;  %v444_v4 = vpop.f32.mrb[5].mxu0 }
 0x176   : > { %v487_v7 = vmul.f32 %v444_v4, %v444_v4  ;;  %1195 = vmatmul.mubr.f32.vlgmr.msra.gmra.mrb[0].mxu1 %v494_v0  ;;  %v809_v0 = vld [vmem:[#allocation7 + $0x48] sm:$0xff] }
 0x177   : > { %1368 = vmatpush3.bf16.msra.mxu1 %v1365_v52  ;;  %v1398_v52 = vpack.c.bf16 %v801_v51, %v800_v50  ;;  %v1410_v1 = vpack.c.bf16 %v809_v0, %v808_v63 }
 0x178   : > { %v495_v8 = vadd.f32 %v487_v7, %v479_v3  ;;  %v448_v9 = vpop.f32.mrb[6].mxu0  ;;  %1370 = vmatprep.subr.bf16.mxu1 %v1369_v2  ;;  %v811_v3 = vld [vmem:[#allocation7 + $0x58] sm:$0xff]  ;;  %v1416_v7 = vpack.c.bf16 %v813_v6, %v812_v5 }
 0x179   : > { %v480_v11 = vmul.f32 %v448_v9, %v448_v9  ;;  %v450_v12 = vpop.f32.mrb[7].mxu0  ;;  %1399 = vmatpush3.bf16.msra.mxu0 %v1398_v52  ;;  %v815_v9 = vld [vmem:[#allocation7 + $0x78] sm:$0xff] }
 0x17a   : > { %v488_v15 = vmul.f32 %v450_v12, %v450_v12  ;;  %1197 = vmatprep.mubr.f32.mxu1 %v495_v8  ;;  %1400 = vmatprep.subr.bf16.mxu0 %v1676_v53  ;;  %v814_v8 = vld [vmem:[#allocation7 + $0x70] sm:$0xff] }
 0x17b   : > { %1372 = vmatpush3.bf16.msra.mxu1 %v1369_v2  ;;  %v810_v2 = vld [vmem:[#allocation7 + $0x50] sm:$0xff] }
 0x17c   : > { %v496_v16 = vadd.f32 %v488_v15, %v480_v11  ;;  %v454_v17 = vpop.f32.mrb[8].mxu0  ;;  %1374 = vmatprep.subr.bf16.mxu1 %v1373_v10  ;;  %v1413_v4 = vpack.c.bf16 %v811_v3, %v810_v2  ;;  %v1678_v11 = vmov 0.0  }
 0x17d   : > { %v481_v19 = vmul.f32 %v454_v17, %v454_v17  ;;  %v456_v20 = vpop.f32.mrb[9].mxu0  ;;  %1402 = vmatpush3.bf16.msra.mxu0 %v1401_v56  ;;  %1282 = vmatprep.mubr.msk.f32.mxu0 %vm1677_vm1, %v1678_v11 }
 0x17e   : > { %v489_v21 = vmul.f32 %v456_v20, %v456_v20  ;;  %1198 = vmatmul.mubr.f32.gmra.mrb[2].mxu1 %v496_v16  ;;  %1403 = vmatprep.subr.bf16.mxu0 %v1676_v53 }
 0x17f   : > { %1376 = vmatpush3.bf16.msra.mxu1 %v1373_v10  ;;  %v1419_v10 = vpack.c.bf16 %v815_v9, %v814_v8 }
 0x180   : > { %v497_v22 = vadd.f32 %v489_v21, %v481_v19  ;;  %v460_v23 = vpop.f32.mrb[10].mxu0  ;;  %1378 = vmatprep.subr.bf16.mxu1 %v1377_v18 }
 0x181   : > { %v482_v24 = vmul.f32 %v460_v23, %v460_v23  ;;  %v462_v25 = vpop.f32.mrb[11].mxu0  ;;  %1405 = vmatpush3.bf16.msra.mxu0 %v1404_v59 }
 0x182   : > { %v490_v26 = vmul.f32 %v462_v25, %v462_v25  ;;  %1200 = vmatprep.mubr.f32.mxu1 %v497_v22  ;;  %1406 = vmatprep.subr.bf16.mxu0 %v1676_v53 }
 0x183   : > { %1380 = vmatpush3.bf16.msra.mxu1 %v1377_v18 }
 0x184   : > { %v498_v27 = vadd.f32 %v490_v26, %v482_v24  ;;  %v466_v28 = vpop.f32.mrb[12].mxu0  ;;  %1382 = vmatprep.subr.bf16.mxu1 %v1381_v40 }
 0x185   : > { %v483_v29 = vmul.f32 %v466_v28, %v466_v28  ;;  %v468_v30 = vpop.f32.mrb[13].mxu0  ;;  %1408 = vmatpush3.bf16.msra.mxu0 %v1407_v62 }
 0x186   : > { %v491_v31 = vmul.f32 %v468_v30, %v468_v30  ;;  %1201 = vmatmul.mubr.f32.gmra.mrb[4].mxu1 %v498_v27  ;;  %1409 = vmatprep.subr.bf16.mxu0 %v1676_v53 }
 0x187   : > { %1384 = vmatpush3.bf16.msra.mxu1 %v1381_v40 }
 0x188   : > { %v499_v32 = vadd.f32 %v491_v31, %v483_v29  ;;  %v472_v33 = vpop.f32.mrb[14].mxu0  ;;  %1386 = vmatprep.subr.bf16.mxu1 %v1385_v43 }
 0x189   : > { %v484_v34 = vmul.f32 %v472_v33, %v472_v33  ;;  %v474_v35 = vpop.f32.mrb[15].mxu0  ;;  %1411 = vmatpush3.bf16.msra.mxu0 %v1410_v1 }
 0x18a   : > { %v492_v36 = vmul.f32 %v474_v35, %v474_v35  ;;  %1203 = vmatprep.mubr.f32.mxu1 %v499_v32  ;;  %1412 = vmatprep.subr.bf16.mxu0 %v1676_v53 }
 0x18b   : > { %1388 = vmatpush3.bf16.msra.mxu1 %v1385_v43 }
 0x18c   : > { %v500_v37 = vadd.f32 %v492_v36, %v484_v34  ;;  %1390 = vmatprep.subr.bf16.mxu1 %v1389_v46 }
 0x18d   : > { %1414 = vmatpush3.bf16.msra.mxu0 %v1413_v4 }
 0x18e   : > { %1204 = vmatmul.mubr.f32.gmra.mrb[6].mxu1 %v500_v37  ;;  %1415 = vmatprep.subr.bf16.mxu0 %v1676_v53 }
 0x18f   : > { %1392 = vmatpush3.bf16.msra.mxu1 %v1389_v46 }
 0x190   : > { %1394 = vmatprep.subr.bf16.mxu1 %v1393_v49 }
 0x191   : > { %1417 = vmatpush3.bf16.msra.mxu0 %v1416_v7 }
 0x192   : > { %1418 = vmatprep.subr.bf16.mxu0 %v1676_v53 }
 0x193   : > { %1396 = vmatpush3.bf16.msra.mxu1 %v1393_v49 }
 0x195   : > { %1420 = vmatpush3.bf16.msra.mxu0 %v1419_v10 }
 0x249   : > { %v1196_v12 = vpop.f32.mrb[0].mxu1 }
 0x24a   : > { %v623_v13 = vmax.f32 %v1196_v12, 1.1920929e-07  ;;  %v583_v14 = vpop.f32.mrb[1].mxu1 }
 0x24b   : > { %v622_v15 = vmax.f32 %v583_v14, 1.1920929e-07 }
 0x24c   : > { %1499 = vlog2.f32 %v623_v13 }
 0x24d   : > { %1501 = vlog2.f32 %v622_v15 }
 0x251   : > { %v1199_v16 = vpop.f32.mrb[2].mxu1 }
 0x252   : > { %v625_v17 = vmax.f32 %v1199_v16, 1.1920929e-07  ;;  %v593_v18 = vpop.f32.mrb[3].mxu1 }
 0x253   : > { %v624_v19 = vmax.f32 %v593_v18, 1.1920929e-07 }
 0x254   : > { %1503 = vlog2.f32 %v625_v17 }
 0x255   : > { %1505 = vlog2.f32 %v624_v19 }
 0x256   : > { %v1500_v20 = vpop.eup %1499 }
 0x257   : > { %v1502_v21 = vpop.eup %1501  ;;  %v633_v22 = vmul.f32 0.6931472, %v1500_v20 }
 0x258   : > { %v631_v23 = vmul.f32 0.6931472, %v1502_v21 }
 0x259   : > { %v1202_v24 = vpop.f32.mrb[4].mxu1 }
 0x25a   : > { %v767_v25 = vadd.f32 %v633_v22, %v631_v23  ;;  %v627_v26 = vmax.f32 %v1202_v24, 1.1920929e-07  ;;  %v603_v27 = vpop.f32.mrb[5].mxu1  ;;  %1238 = vmatprep.mubr.f32.mxu1 %v631_v23  ;;  %v1679_v23 = vmov 1966171168  }
 0x25b   : > { %v626_v28 = vmax.f32 %v603_v27, 1.1920929e-07  ;;  %1239 = vmatmul.mubr.f32.vlgmr.msra.gmra.mrb[8].mxu1 %v633_v22  ;;  %v899_v24 = vunpack.c.l.s4 %v1679_v23 }
 0x25c   : > { %v768_v29 = vrot.slane %v767_v25, 4  ;;  %1507 = vlog2.f32 %v627_v26 }
 0x25d   : > { %1509 = vlog2.f32 %v626_v28  ;;  %v900_v26 = vunpack.c.0.s8 %v899_v24 }
 0x25e   : > { %v1504_v30 = vpop.eup %1503  ;;  %v769_v31 = vadd.f32 %v768_v29, %v767_v25  ;;  %v901_v25 = vlaneseq }
 0x25f   : > { %v1506_v32 = vpop.eup %1505  ;;  %v637_v33 = vmul.f32 0.6931472, %v1504_v30 }
 0x260   : > { %v770_v34 = vrot.slane %v769_v31, 2  ;;  %v635_v35 = vmul.f32 0.6931472, %v1506_v32  ;;  %v902_v27 = vshrl.u32 %v901_v25, 7 }
 0x261   : > { %v1205_v36 = vpop.f32.mrb[6].mxu1 }
 0x262   : > { %v774_v37 = vadd.f32 %v637_v33, %v635_v35  ;;  %v629_v38 = vmax.f32 %v1205_v36, 1.1920929e-07  ;;  %v613_v39 = vpop.f32.mrb[7].mxu1  ;;  %1241 = vmatprep.mubr.f32.mxu1 %v635_v35  ;;  %v771_v41 = vadd.f32 %v770_v34, %v769_v31  ;;  %v903_v28 = vsub.s32 %v900_v26, %v902_v27 }
 0x263   : > { %v628_v40 = vmax.f32 %v613_v39, 1.1920929e-07  ;;  %1242 = vmatmul.mubr.f32.gmra.mrb[10].mxu1 %v637_v33  ;;  %v924_v31 = vsub.s32 0, %v902_v27 }
 0x264   : > { %v775_v42 = vrot.slane %v774_v37, 4  ;;  %1511 = vlog2.f32 %v629_v38  ;;  %v772_v47 = vrot.slane %v771_v41, 1 }
 0x265   : > { %1513 = vlog2.f32 %v628_v40 }
 0x266   : > { %v1508_v43 = vpop.eup %1507  ;;  %v776_v44 = vadd.f32 %v775_v42, %v774_v37  ;;  %v773_v52 = vadd.f32 %v772_v47, %v771_v41 }
 0x267   : > { %v1510_v45 = vpop.eup %1509  ;;  %v641_v46 = vmul.f32 0.6931472, %v1508_v43 }
 0x268   : > { %v777_v48 = vrot.slane %v776_v44, 2  ;;  %v639_v49 = vmul.f32 0.6931472, %v1510_v45  ;;  %v796_v60 = vmul.f32 0.0625, %v773_v52 }
 0x26a   : > { %v778_v50 = vadd.f32 %v777_v48, %v776_v44  ;;  %v781_v51 = vadd.f32 %v641_v46, %v639_v49  ;;  %1244 = vmatprep.mubr.f32.mxu1 %v639_v49 }
 0x26b   : > { %1245 = vmatmul.mubr.f32.gmra.mrb[12].mxu1 %v641_v46 }
 0x26c   : > { %v779_v53 = vrot.slane %v778_v50, 1  ;;  %v782_v54 = vrot.slane %v781_v51, 4 }
 0x26e   : > { %v1512_v55 = vpop.eup %1511  ;;  %v780_v56 = vadd.f32 %v779_v53, %v778_v50  ;;  %v783_v57 = vadd.f32 %v782_v54, %v781_v51 }
 0x26f   : > { %v1514_v58 = vpop.eup %1513  ;;  %v645_v59 = vmul.f32 0.6931472, %v1512_v55 }
 0x270   : > { %v797_v61 = vmul.f32 0.0625, %v780_v56  ;;  %v784_v62 = vrot.slane %v783_v57, 2  ;;  %v643_v63 = vmul.f32 0.6931472, %v1514_v58 }
 0x272   : > { %v785_v0 = vadd.f32 %v784_v62, %v783_v57  ;;  %v788_v1 = vadd.f32 %v645_v59, %v643_v63  ;;  %1247 = vmatprep.mubr.f32.mxu1 %v643_v63  ;;  %v821_v2 = vsel %vm820_vm2, %v797_v61, %v796_v60 }
 0x273   : > { %1248 = vmatmul.mubr.f32.gmra.mrb[14].mxu1 %v645_v59 }
 0x274   : > { %v786_v3 = vrot.slane %v785_v0, 1  ;;  %v789_v4 = vrot.slane %v788_v1, 4 }
 0x276   : > { %v787_v5 = vadd.f32 %v786_v3, %v785_v0  ;;  %v790_v6 = vadd.f32 %v789_v4, %v788_v1 }
 0x278   : > { %v798_v7 = vmul.f32 0.0625, %v787_v5  ;;  %v791_v8 = vrot.slane %v790_v6, 2 }
 0x27a   : > { %v792_v9 = vadd.f32 %v791_v8, %v790_v6  ;;  %v823_v10 = vsel %vm822_vm3, %v798_v7, %v821_v2 }
 0x27c   : > { %v793_v11 = vrot.slane %v792_v9, 1 }
 0x27e   : > { %v794_v12 = vadd.f32 %v793_v11, %v792_v9 }
 0x280   : > { %v799_v13 = vmul.f32 0.0625, %v794_v12 }
 0x282   : > { %v825_v14 = vsel %vm824_vm4, %v799_v13, %v823_v10 }
 0x283   : > { %1283 = vmatmul.mubr.f32.vlgmr.msra.gmra.mrb[16].mxu0 %v825_v14 }
 0x32e   : > { %v1240_v15 = vpop.f32.mrb[8].mxu1 }
 0x32f   : > { %v728_v16 = vpop.f32.mrb[9].mxu1 }
 0x336   : > { %v1243_v17 = vpop.f32.mrb[10].mxu1 }
 0x337   : > { %v738_v18 = vpop.f32.mrb[11].mxu1 }
 0x33e   : > { %v1246_v19 = vpop.f32.mrb[12].mxu1 }
 0x33f   : > { %v748_v20 = vpop.f32.mrb[13].mxu1 }
 0x346   : > { %v1249_v21 = vpop.f32.mrb[14].mxu1 }
 0x347   : > { %v758_v22 = vpop.f32.mrb[15].mxu1 }
 0x356   : > { %v893_v29 = vpop.f32.mrb[16].mxu0 }
 0x357   : > { %v904_v30 = vrot.slane %v893_v29, %v903_v28  ;;  %v1284_v32 = vpop.f32.mrb[17].mxu0 }
 0x359   : > { %v905_v33 = vcombine.high %v904_v30, %v904_v30  ;;  %v912_v34 = vrot.slane %v904_v30, %v903_v28 }
 0x35b   : > { %v919_v35 = vrot.slane %v905_v33, %v903_v28  ;;  %v920_v36 = vcombine.high %v912_v34, %v912_v34  ;;  %v925_v37 = vrot.slane %v912_v34, %v924_v31 }
 0x35d   : > { %v921_v38 = vcombine.high %v919_v35, %v919_v35  ;;  %v929_v39 = vrot.slane %v919_v35, %v924_v31  ;;  %v933_v40 = vrot.slane %v920_v36, %v924_v31  ;;  %v942_v41 = vsub.f32 %v728_v16, %v925_v37 }
 0x35e   : > { %v943_v42 = vsub.f32 %v1240_v15, %v925_v37 }
 0x35f   : > { %v937_v43 = vrot.slane %v921_v38, %v924_v31  ;;  %v944_v44 = vsub.f32 %v738_v18, %v929_v39  ;;  %v945_v45 = vsub.f32 %v1243_v17, %v929_v39  ;;  %v946_v46 = vsub.f32 %v748_v20, %v933_v40  ;;  %950 = vst [vmem:[%s264_s17] sm:$0xff] %v942_v41 }
 0x360   : > { %v947_v47 = vsub.f32 %v1246_v19, %v933_v40  ;;  %951 = vst [vmem:[%s264_s17 + $0x8] sm:$0xff] %v943_v42 }
 0x361   : > { %v948_v48 = vsub.f32 %v758_v22, %v937_v43  ;;  %v949_v49 = vsub.f32 %v1249_v21, %v937_v43  ;;  %952 = vst [vmem:[%s264_s17 + $0x10] sm:$0xff] %v944_v44  ;;  %953 = vst [vmem:[%s264_s17 + $0x18] sm:$0xff] %v945_v45 }
 0x362   : > { %954 = vst [vmem:[%s264_s17 + $0x20] sm:$0xff] %v946_v46  ;;  %955 = vst [vmem:[%s264_s17 + $0x28] sm:$0xff] %v947_v47 }
 0x363   : > { %956 = vst [vmem:[%s264_s17 + $0x30] sm:$0xff] %v948_v48  ;;  %957 = vst [vmem:[%s264_s17 + $0x38] sm:$0xff] %v949_v49 }
 0x364   : > { %1612 = shalt.err (!%p1609_p9)
}
 0x365   : > { %s1613_s30 = scalar_lea.hbm %s2057_s8, 1024  ;;  %s1617_s11 = scalar_lea.hbm %s2109_s5, 2048 }
 0x366   : > { %p1614_p2 = scmp.ne.s32.totalorder %s2057_s8, %s1613_s30  ;;  %p1618_p5 = scmp.lt.u32.totalorder %s2057_s8, %s2109_s5 }
 0x367   : > { %p1619_p10 = scmp.lt.u32.totalorder %s1617_s11, %s1613_s30  ;;  %p1621_p4 = scmp.lt.u32.totalorder %s1613_s30, %s2057_s8 }
 0x368   : > { %p1615_p0 = pnand %p1614_p2, %p2124_p7 }
 0x369   : > { %p1620_p12 = por %p1619_p10, %p1618_p5 }
 0x36a   : > { %p1616_p3 = pneg %p1615_p0 }
 0x36b   : > { %p1622_p8 = por %p1621_p4, %p1620_p12 }
 0x36d   : > { %p1623_p11 = pnand %p1622_p8, %p1616_p3 }
 0x36f   : > { %1626 = shalt.err (!%p1623_p11)
}
 0x370   : > { %s1681_s15 = smov 128   ;;  %s1682_s16 = smov 8  }
 0x371   : > { %1433 = dma.vmem_to_hbm [thread:$0]  (%p2124_p7), %s2059_s25, 1024, %s2057_s8, %s2063_s22, %s1681_s15, %s1681_s15, %s1682_s16  }
 0x372 PF: > { %p1455_p13 = scmp.ge.s32.totalorder %s1669_s21, 2  ;;  %s988_s17 = sand.u32 1, %s1657_s18  }
 0x373   : > { %p2125_p1 = scmp.ne.s32.totalorder %s2115_s29, 0  ;;  %s989_s6 = scalar_lea.sflag [#allocation4], %s988_s17 }
 0x375   : > { %p1446_p6 = pnand %p1455_p13, %p2125_p1 }
 0x377   : > { %1652 = dma.done.wait (!%p1446_p6), %s989_s6, 1024  }
 0x378   : > { %1654 = vsyncadd (!%p1446_p6), %s989_s6, 4294966272  ;;  %s2126_s7 = sld [smem:[#allocation12_spill]]  ;;  %p17_p9 = scmp.ge.s32.totalorder %s1738_s24, 4  }
 0x379   : > { %s2127_s18 = smov %s1661_s19  ;;  %s2128_s19 = smov %s1665_s20 }
 0x37a   : > { %s2130_s21 = smov %s1738_s24  ;;  %19 = sbr.rel (!%p17_p9) target bundleno = 5 (0x5), region = 88 }
 0x37e   : > { %s2129_s20 = smov %s2126_s7 }
 0x381   :  { %994 = vsyncpa [#allocation3], 1 }
 0x382   :  { %996 = vsyncpa [#allocation3 + $0x1], 1 }
 0x383   :  { %997 = vsyncpa [#allocation6], 1 }
 0x384   :  { %998 = vsyncpa [#allocation4], 1 }
 0x385   :  { %1000 = vsyncpa [#allocation4 + $0x1], 1 }

</bundles_post_ra>
